<compile_context>
chip_gen: v6e
topology: v6e:2x2x1
jax: 0.10.0
libtpu: 0.0.40
codegen_flags: <defaults>
</compile_context>

<pallas_src>
import functools

import jax
import jax.numpy as jnp
from jax.experimental import pallas as pl
from jax.experimental.pallas import tpu as pltpu


def _qnet_kernel(state_ref, w_ref, q_ref):
    # state_ref: (tb, S); w_ref: (A, S) (PyTorch layout, NOT transposed);
    # q_ref: (tb, A).  q = state @ W^T == contract dim 1 of both operands.
    q_ref[...] = jax.lax.dot_general(
        state_ref[...],
        w_ref[...],
        dimension_numbers=(((1,), (1,)), ((), ())),
        preferred_element_type=jnp.float32,
    ).astype(q_ref.dtype)


@functools.partial(jax.jit, static_argnames=("block_b",))
def qnetwork_forward(state, weight, *, block_b=4096):
    """Pallas equivalent of QNetwork.forward.

    state:  (B, num_states)
    weight: (num_actions, num_states)  -- PyTorch nn.Linear layout (bias=False)
    returns (B, num_actions) float32
    """
    B, S = state.shape
    A, S2 = weight.shape
    assert S == S2

    # Compute in whatever dtype `state` already arrives in (don't add an HBM
    # read+write cast pass over the big tensor). The tiny weight follows it.
    if weight.dtype != state.dtype:
        weight = weight.astype(state.dtype)
    state_itemsize = jnp.dtype(state.dtype).itemsize

    # Batch tile sizing:
    #  - double-buffered state tile + double-buffered f32 output tile must fit
    #    a conservative VMEM budget (safe even on v7x's 64 MiB physical VMEM;
    #    weight is single-buffered and tiny, counted in the headroom).
    #  - tb must be a multiple of 8 (f32 sublane) unless it is the full batch.
    vmem_budget = 24 * 1024 * 1024
    row_bytes = 2 * (S * state_itemsize + A * 4)
    tb_vmem = max(8, (vmem_budget // row_bytes) // 8 * 8)
    tb = min(block_b, tb_vmem)
    if B <= tb:
        tb = B                      # single full-extent block, no masking
    else:
        tb = max(8, (tb // 8) * 8)  # streamed tiles; last block ragged/masked
    grid = pl.cdiv(B, tb)

    return pl.pallas_call(
        _qnet_kernel,
        out_shape=jax.ShapeDtypeStruct((B, A), jnp.float32),
        grid_spec=pl.GridSpec(
            grid=(grid,),
            in_specs=[
                # state tiles stream along the (ragged) batch grid axis
                pl.BlockSpec((tb, S), lambda i: (i, 0)),
                # weight: constant index_map -> loaded once, VMEM-resident;
                # single-buffered since it never changes across the grid.
                pl.BlockSpec((A, S), lambda i: (0, 0),
                             pipeline_mode=pl.Buffered(1)),
            ],
            out_specs=pl.BlockSpec((tb, A), lambda i: (i, 0)),
        ),
        compiler_params=pltpu.CompilerParams(
            # Batch tiles are independent. (On v7x, pltpu.CORE_PARALLEL on this
            # axis would shard the loop across both TensorCores; kept as the
            # portable "parallel" here so the kernel lowers on all generations.)
            dimension_semantics=("parallel",),
            vmem_limit_bytes=32 * 1024 * 1024,
        ),
    )(state, weight)


if __name__ == "__main__":
    key = jax.random.PRNGKey(0)
    k_state, k_w, k_wbig, k_sbig = jax.random.split(key, 4)

    batch = 2
    num_states = 32
    num_actions = 8

    state = jax.random.normal(k_state, (batch, num_states), dtype=jnp.float32)

    # 1) Module-faithful init: nn.init.uniform_(weight, -1e-6, 1e-6), bias=False.
    w_spec = jax.random.uniform(
        k_w, (num_actions, num_states), dtype=jnp.float32,
        minval=-1e-6, maxval=1e-6,
    )
    q_spec = jax.block_until_ready(qnetwork_forward(state, w_spec))
    assert q_spec.shape == (batch, num_actions)
    assert jnp.allclose(q_spec, state @ w_spec.T, atol=1e-7, rtol=1e-3)

    # 2) O(1)-scale weights so a transposed-weight / dropped-row bug cannot hide
    #    under the tiny init scale.
    w_big = jax.random.normal(
        k_wbig, (num_actions, num_states), dtype=jnp.float32
    )
    q_big = jax.block_until_ready(qnetwork_forward(state, w_big))
    assert q_big.shape == (batch, num_actions)
    assert jnp.allclose(q_big, state @ w_big.T, atol=5e-2, rtol=1e-2)

    # 3) Ragged multi-tile batch path: grid > 1 with a masked tail block
    #    (exercises the cdiv-grid streaming path without any wrapper padding).
    big_batch = 100
    state_big = jax.random.normal(
        k_sbig, (big_batch, num_states), dtype=jnp.float32
    )
    q_multi = jax.block_until_ready(
        qnetwork_forward(state_big, w_big, block_b=64)
    )
    assert q_multi.shape == (big_batch, num_actions)
    assert jnp.allclose(q_multi, state_big @ w_big.T, atol=5e-2, rtol=1e-2)

    print("KERNEL_OK")
</pallas_src>

<mosaic_0001>
module attributes {stable_mosaic.version = 11 : i64} {
  func.func @_qnet_kernel(%arg0: i32, %arg1: memref<2x32xf32, #tpu.memory_space<vmem>>, %arg2: memref<8x32xf32, #tpu.memory_space<vmem>>, %arg3: memref<2x8xf32, #tpu.memory_space<vmem>>) attributes {dimension_semantics = [#tpu.dimension_semantics<parallel>], iteration_bounds = array<i64: 1>, scalar_prefetch = 0 : i64, scratch_operands = 0 : i64, tpu.core_type = #tpu.core_type<tc>, window_params = [{transform_indices = @transform_0, window_bounds = array<i64: 2, 32>}, {pipeline_mode = #tpu.pipeline_mode<synchronous>, transform_indices = @transform_1, window_bounds = array<i64: 8, 32>}, {transform_indices = @transform_2, window_bounds = array<i64: 2, 8>}]} {
    %c0 = arith.constant 0 : index
    %c0_0 = arith.constant 0 : index
    %0 = vector.load %arg1[%c0, %c0_0] : memref<2x32xf32, #tpu.memory_space<vmem>>, vector<2x32xf32>
    %c0_1 = arith.constant 0 : index
    %c0_2 = arith.constant 0 : index
    %1 = vector.load %arg2[%c0_1, %c0_2] : memref<8x32xf32, #tpu.memory_space<vmem>>, vector<8x32xf32>
    %cst = arith.constant dense<0.000000e+00> : vector<2x8xf32>
    %2 = tpu.matmul %0, %1, %cst {dimension_numbers = #tpu.dot_dimension_numbers<[1], [1], [0], [0], [0, 0, 1, 0], [], []>} : vector<2x32xf32>, vector<8x32xf32>, vector<2x8xf32> -> vector<2x8xf32>
    %c0_3 = arith.constant 0 : index
    %c0_4 = arith.constant 0 : index
    %3 = vector.load %arg3[%c0_3, %c0_4] : memref<2x8xf32, #tpu.memory_space<vmem>>, vector<2x8xf32>
    tpu.vector_store %arg3[%c0_3, %c0_4], %2 {strides = array<i32>} : memref<2x8xf32, #tpu.memory_space<vmem>>, vector<2x8xf32>,
    return
  }
  func.func @transform_0(%arg0: i32) -> (i32, i32) {
    %c0_i32 = arith.constant 0 : i32
    %c0_i32_0 = arith.constant 0 : i32
    return %arg0, %c0_i32 : i32, i32
  }
  func.func @transform_1(%arg0: i32) -> (i32, i32) {
    %c0_i32 = arith.constant 0 : i32
    %c0_i32_0 = arith.constant 0 : i32
    %c0_i32_1 = arith.constant 0 : i32
    return %c0_i32, %c0_i32_0 : i32, i32
  }
  func.func @transform_2(%arg0: i32) -> (i32, i32) {
    %c0_i32 = arith.constant 0 : i32
    %c0_i32_0 = arith.constant 0 : i32
    return %arg0, %c0_i32 : i32, i32
  }
}

</mosaic_0001>

<bundles_post_ra>
// kernel: qnetwork_forward.1
= control target key start
LH: loop header
LB: loop body
LE: loop exit
PB: predicated region body
PF: predicated region fallthrough
CT: control target
= control target key end

     0   :  { %7 = vsyncpa [#allocation3], 0  ;;  %s242_s0 = inlined_call_operand.hbm [shape: f32[2,32], index: 0, kind: input, shape index: {}]   ;;  %s243_s1 = inlined_call_operand.hbm [shape: f32[8,32], index: 1, kind: input, shape index: {}]   ;;  %s244_s2 = inlined_call_operand.hbm [shape: f32[2,8], index: 2, kind: output, shape index: {}]  }
   0x1   :  { %8 = vsyncpa [#allocation6], 0 }
   0x2   :  { %9 = vsyncpa [#allocation4], 0  ;;  %s213_s9 = smov [#allocation2]   ;;  %s214_s11 = smov [#allocation5]  }
   0x3   :  { %s16_s10 = sshll.u32 %s213_s9, 4  ;;  %s26_s12 = sshll.u32 %s214_s11, 4  ;;  %s17_s10 = int_to_ptr.vmem [resolvable:$true] %s16_s10  ;;  %s27_s12 = int_to_ptr.vmem [resolvable:$true] %s26_s12 }
   0x4   :  { %s155_s13 = scalar_lea.vmem %s17_s10, 32  ;;  %p160_p1 = scmp.lt.s32.totalorder %s17_s10, %s17_s10 }
   0x5   :  { %p156_p0 = scmp.ne.s32.totalorder %s17_s10, %s155_s13  ;;  %p161_p2 = scmp.lt.s32.totalorder %s155_s13, %s155_s13 }
   0x7   :  { %p162_p3 = por %p161_p2, %p160_p1 }
   0x9   :  { %p163_p4 = pnand %p162_p3, %p156_p0 }
   0xb   :  { %166 = shalt.err (!%p163_p4)
}
   0xc   :  { %19 = dma.hbm_to_vmem [thread:$0]  %s242_s0, 32, %s17_s10, [#allocation3]  }
   0xd   :  { %s175_s16 = scalar_lea.vmem %s27_s12, 128  ;;  %p180_p6 = scmp.lt.s32.totalorder %s27_s12, %s27_s12 }
   0xe   :  { %p176_p5 = scmp.ne.s32.totalorder %s27_s12, %s175_s16  ;;  %p181_p7 = scmp.lt.s32.totalorder %s175_s16, %s175_s16 }
  0x10   :  { %p182_p8 = por %p181_p7, %p180_p6 }
  0x12   :  { %p183_p9 = pnand %p182_p8, %p176_p5 }
  0x14   :  { %186 = shalt.err (!%p183_p9)
}
  0x15   :  { %29 = dma.hbm_to_vmem [thread:$0]  %s243_s1, 128, %s27_s12, [#allocation6]  }
  0x16   :  { %207 = dma.done.wait [#allocation3], 32  }
  0x17   :  { %208 = vsyncadd [#allocation3], 4294967264 }
  0x18   :  { %209 = dma.done.wait [#allocation6], 128  }
  0x19   :  { %210 = vsyncadd [#allocation6], 4294967168  ;;  %v215_v0 = vmov 0.0   ;;  %vm216_vm0 = vmmov 0   ;;  %vm38_vm1 = vcmask 261120   ;;  %v37_v1 = vld [vmem:[#allocation5] sm:$0xff] }
  0x1a   :  { %137 = vmatprep.subr.mxu0 %v215_v0  ;;  %139 = vmatprep.mubr.msk.f32.mxu0 %vm216_vm0, %v215_v0  ;;  %v36_v2 = vld [vmem:[#allocation2] sm:$0x3]  ;;  %s217_s0 = smov [#allocation7]   ;;  %vm115_vm2 = vcmask 58368  }
  0x1b   :  { %138 = vmatpush3.xpose.msk.msra.mxu0 %vm38_vm1, %v37_v1  ;;  %s123_s19 = sshll.u32 %s217_s0, 4  ;;  %s124_s19 = int_to_ptr.vmem [resolvable:$true] %s123_s19 }
  0x1c   :  { %s187_s1 = scalar_lea.vmem %s124_s19, 32  ;;  %p192_p11 = scmp.lt.s32.totalorder %s124_s19, %s124_s19 }
  0x1d   :  { %p188_p10 = scmp.ne.s32.totalorder %s124_s19, %s187_s1  ;;  %p193_p12 = scmp.lt.s32.totalorder %s187_s1, %s187_s1 }
  0x1e   :  { %140 = vmatmul.mubr.msk.f32.vlgmr.msra.gmra.mxu0 %vm38_vm1, %v36_v2 }
  0x1f   :  { %p194_p13 = por %p193_p12, %p192_p11 }
  0x21   :  { %p195_p0 = pnand %p194_p13, %p188_p10 }
  0xde   :  { %v111_v3 = vpop.f32.mrf.mxu0 }
  0xdf   :  { %116 = vst.msk [vmem:[#allocation7] sm:$0x3] %vm115_vm2, %v111_v3 }
  0xe0   :  { %v141_v4 = vpop.f32.mrf.mxu0 }
  0xe1   :  { %198 = shalt.err (!%p195_p0)
}
  0xe2   :  { %126 = dma.vmem_to_hbm [thread:$0]  %s124_s19, 32, %s244_s2, [#allocation4]  }
  0xe3   :  { %211 = dma.done.wait [#allocation4], 32  }
  0xe4   :  { %212 = vsyncadd [#allocation4], 4294967264 }
  0xe5   :  { %130 = vsyncpa [#allocation3], 1 }
  0xe6   :  { %131 = vsyncpa [#allocation6], 1 }
  0xe7   :  { %132 = vsyncpa [#allocation4], 1 }

</bundles_post_ra>
